<compile_context>
chip_gen: v7x
topology: tpu7x:2x2x1
jax: 0.10.0
libtpu: 0.0.40
codegen_flags: <defaults>
</compile_context>

<pallas_src>
import functools

import jax
import jax.numpy as jnp
from jax.experimental import pallas as pl
from jax.experimental.pallas import tpu as pltpu


def _round_up(x: int, n: int) -> int:
    return ((x + n - 1) // n) * n


def pipeline_kernel(w_agg_ref, x_ref, W_ref, b_ref, y_ref,
                    preds_ref, final_ref, loss_ref, sq_acc_ref,
                    *, n_modules, batch, frames, tile_b,
                    module_loss_scale, final_loss_scale):
    """One (batch_tile, module_line) grid step: encoder + fusion/loss accumulation."""
    bi = pl.program_id(0)          # batch-tile index   ("parallel")
    m = pl.program_id(1)           # module-line index  ("arbitrary", innermost)

    y = y_ref[...]                 # (tile_b, Fp) f32 multi-hot labels (resident per bi)

    # encoder line m: linear(hidden -> frames) + sigmoid; bf16 MXU feed, f32 accumulate.
    logits = jnp.dot(x_ref[...], W_ref[...],
                     preferred_element_type=jnp.float32) + b_ref[...]
    p = jax.nn.sigmoid(logits)                       # (tile_b, Fp) f32
    preds_ref[...] = p.astype(preds_ref.dtype)       # "single_predictions[m]"

    # Per-module squared error: elementwise accumulate only; the costly
    # cross-lane reduce is deferred to the last module line (one XLU reduce).
    d = p - y
    sq = d * d

    @pl.when(m == 0)
    def _():
        final_ref[...] = jnp.zeros_like(final_ref)
        sq_acc_ref[...] = jnp.zeros_like(sq_acc_ref)

    final_ref[...] += w_agg_ref[m] * p               # softmax-weighted late fusion
    sq_acc_ref[...] += sq

    # Finalize this batch tile after the last module line.
    @pl.when(m == n_modules - 1)
    def _():
        tb, fp = y_ref.shape
        row = jax.lax.broadcasted_iota(jnp.int32, (tb, fp), 0) + bi * tile_b
        col = jax.lax.broadcasted_iota(jnp.int32, (tb, fp), 1)
        mask = jnp.logical_and(row < batch, col < frames).astype(jnp.float32)

        final = final_ref[...]
        df = final - y
        # module SSE and final-aggregation SSE folded into a single masked reduce.
        combined = (module_loss_scale * sq_acc_ref[...]
                    + final_loss_scale * (df * df))
        partial = jnp.sum(combined * mask)
        loss_ref[...] = jnp.broadcast_to(partial, loss_ref.shape)


def prepare_pipeline_params(Ws, bs, agg_logits):
    """Pad + cast the per-line encoder weights ONCE (hoisted out of the hot path)."""
    M, H, F = Ws.shape
    Fp = _round_up(F, 128)
    Ws_p = jnp.zeros((M, H, Fp), jnp.bfloat16).at[:, :, :F].set(Ws.astype(jnp.bfloat16))
    bs_p = jnp.zeros((M, 1, Fp), jnp.float32).at[:, 0, :F].set(bs.astype(jnp.float32))
    w_agg = jax.nn.softmax(agg_logits.astype(jnp.float32))   # final_aggregator weights
    return Ws_p, bs_p, w_agg


@functools.partial(jax.jit, static_argnames=("module_loss_scale", "final_loss_scale"))
def pipeline_forward(Ws_p, bs_p, w_agg, xs, labels,
                     module_loss_scale=1.0, final_loss_scale=1.0):
    """Returns (final_prediction, ground_truth_labels, loss, per_line_preds)."""
    M, B, H = xs.shape
    F = labels.shape[-1]
    Fp = Ws_p.shape[-1]

    # bf16 packs 16 sublanes per vreg -> batch tiles padded to a multiple of 16.
    tile_b = 128 if B > 128 else _round_up(B, 16)
    Bp = _round_up(B, tile_b)
    nb = Bp // tile_b

    # Per-call activations / labels (weights were prepared once, above).
    xs_p = jnp.zeros((M, Bp, H), jnp.bfloat16).at[:, :B, :].set(xs.astype(jnp.bfloat16))
    y_p = jnp.zeros((Bp, Fp), jnp.float32).at[:B, :F].set(labels.astype(jnp.float32))

    kernel = functools.partial(
        pipeline_kernel,
        n_modules=M, batch=B, frames=F, tile_b=tile_b,
        module_loss_scale=float(module_loss_scale),
        final_loss_scale=float(final_loss_scale),
    )

    # TODO(synk): per-line preds could be emitted as bf16 (halves the dominant
    # HBM writeback) if downstream tolerates ~1e-2 relative error on probabilities.
    preds_dtype = jnp.float32
    preds_isz = jnp.dtype(preds_dtype).itemsize

    # VMEM budget: double-buffered per-step blocks + scratch, with headroom.
    per_step = (tile_b * H * 2 + H * Fp * 2 + Fp * 4 + tile_b * Fp * 4        # input blocks
                + tile_b * Fp * preds_isz + tile_b * Fp * 4 + 8 * 128 * 4)    # output blocks
    buffers = 2 * per_step + tile_b * Fp * 4                                  # + sq_acc scratch
    vmem_limit = int(min(max(4 * buffers, 32 << 20), 64 << 20))

    cost = pl.CostEstimate(
        flops=2 * M * Bp * H * Fp + 8 * M * Bp * Fp,
        transcendentals=M * Bp * Fp,                                          # sigmoid
        bytes_accessed=(xs_p.size * 2 + Ws_p.size * 2 + bs_p.size * 4 + y_p.size * 4
                        + M * Bp * Fp * preds_isz + Bp * Fp * 4 + nb * 8 * 128 * 4),
    )

    grid_spec = pltpu.PrefetchScalarGridSpec(
        num_scalar_prefetch=0,
        grid=(nb, M),                                                         # (batch tiles, lines)
        in_specs=[
            pl.BlockSpec(memory_space=pltpu.MemorySpace.SMEM),                # w_agg (M,) scalars
            pl.BlockSpec((None, tile_b, H), lambda bi, m: (m, bi, 0)),        # xs   (M, Bp, H)
            pl.BlockSpec((None, H, Fp), lambda bi, m: (m, 0, 0)),             # Ws   (M, H, Fp)
            pl.BlockSpec((None, 1, Fp), lambda bi, m: (m, 0, 0)),             # bs   (M, 1, Fp)
            pl.BlockSpec((tile_b, Fp), lambda bi, m: (bi, 0)),                # labels (Bp, Fp)
        ],
        out_specs=[
            pl.BlockSpec((None, tile_b, Fp), lambda bi, m: (m, bi, 0)),       # per-line preds
            pl.BlockSpec((tile_b, Fp), lambda bi, m: (bi, 0)),                # fused prediction
            pl.BlockSpec((None, 8, 128), lambda bi, m: (bi, 0, 0)),           # per-tile loss partial
        ],
        scratch_shapes=[pltpu.VMEM((tile_b, Fp), jnp.float32)],               # sq_acc
    )

    preds_p, final_p, loss_p = pl.pallas_call(
        kernel,
        grid_spec=grid_spec,
        out_shape=[
            jax.ShapeDtypeStruct((M, Bp, Fp), preds_dtype),
            jax.ShapeDtypeStruct((Bp, Fp), jnp.float32),
            jax.ShapeDtypeStruct((nb, 8, 128), jnp.float32),
        ],
        compiler_params=pltpu.CompilerParams(
            dimension_semantics=("parallel", "arbitrary"),
            vmem_limit_bytes=vmem_limit),
        cost_estimate=cost,
    )(w_agg, xs_p, Ws_p, bs_p, y_p)

    # Slice padded outputs back to logical (B, F); normalize loss once (mean over B*F).
    final = final_p[:B, :F]
    preds = preds_p[:, :B, :F]
    loss = jnp.sum(loss_p[:, 0, 0]) * (1.0 / float(B * F))
    return final, labels, loss, preds


def pipeline_reference(xs, Ws, bs, labels, agg_logits,
                       module_loss_scale=1.0, final_loss_scale=1.0):
    """Pure-JAX reference (same bf16-matmul / f32-accumulate precision as the kernel)."""
    w_agg = jax.nn.softmax(agg_logits)
    logits = jnp.einsum("mbh,mhf->mbf",
                        xs.astype(jnp.bfloat16), Ws.astype(jnp.bfloat16),
                        preferred_element_type=jnp.float32) + bs[:, None, :]
    preds = jax.nn.sigmoid(logits)
    final = jnp.einsum("m,mbf->bf", w_agg, preds)
    loss = module_loss_scale * jnp.sum(jnp.mean((preds - labels[None]) ** 2, axis=(1, 2)))
    loss = loss + final_loss_scale * jnp.mean((final - labels) ** 2)
    return final, labels, loss, preds


if __name__ == "__main__":
    M, B, H, F = 3, 4, 32, 16   # module lines, batch, hidden, frames

    key = jax.random.PRNGKey(0)
    k_x, k_w, k_b, k_a, k_y = jax.random.split(key, 5)

    xs = jax.random.normal(k_x, (M, B, H), dtype=jnp.float32)
    Ws = jax.random.normal(k_w, (M, H, F), dtype=jnp.float32) * 0.1
    bs = jax.random.normal(k_b, (M, F), dtype=jnp.float32) * 0.1
    agg_logits = jax.random.normal(k_a, (M,), dtype=jnp.float32)
    labels = (jax.random.uniform(k_y, (B, F)) > 0.5).astype(jnp.float32)  # multi-hot

    Ws_p, bs_p, w_agg = prepare_pipeline_params(Ws, bs, agg_logits)       # hoisted weight prep
    final, gt, loss, preds = jax.block_until_ready(
        pipeline_forward(Ws_p, bs_p, w_agg, xs, labels,
                         module_loss_scale=1.0, final_loss_scale=1.0))

    # correctness check against the pure-JAX reference
    final_r, _, loss_r, preds_r = pipeline_reference(xs, Ws, bs, labels, agg_logits)
    assert jnp.allclose(final, final_r, rtol=1e-3, atol=1e-3), (final, final_r)
    assert jnp.allclose(preds, preds_r, rtol=1e-3, atol=1e-3)
    assert jnp.allclose(loss, loss_r, rtol=1e-3, atol=1e-3), (loss, loss_r)

    print("KERNEL_OK")
</pallas_src>

<mosaic_0001>
module attributes {stable_mosaic.version = 11 : i64} {
  func.func @pipeline_kernel(%arg0: i32, %arg1: i32, %arg2: memref<3xf32, #tpu.memory_space<smem>>, %arg3: memref<1x16x32xbf16, #tpu.memory_space<vmem>>, %arg4: memref<1x32x128xbf16, #tpu.memory_space<vmem>>, %arg5: memref<1x1x128xf32, #tpu.memory_space<vmem>>, %arg6: memref<16x128xf32, #tpu.memory_space<vmem>>, %arg7: memref<1x16x128xf32, #tpu.memory_space<vmem>>, %arg8: memref<16x128xf32, #tpu.memory_space<vmem>>, %arg9: memref<1x8x128xf32, #tpu.memory_space<vmem>>, %arg10: memref<16x128xf32, #tpu.memory_space<vmem>>) attributes {dimension_semantics = [#tpu.dimension_semantics<parallel>, #tpu.dimension_semantics<arbitrary>], iteration_bounds = array<i64: 1, 3>, scalar_prefetch = 0 : i64, scratch_operands = 1 : i64, tpu.core_type = #tpu.core_type<tc>, window_params = [{transform_indices = @transform_0, window_bounds = array<i64: 3>}, {transform_indices = @transform_1, window_bounds = array<i64: 1, 16, 32>}, {transform_indices = @transform_2, window_bounds = array<i64: 1, 32, 128>}, {transform_indices = @transform_3, window_bounds = array<i64: 1, 1, 128>}, {transform_indices = @transform_4, window_bounds = array<i64: 16, 128>}, {transform_indices = @transform_5, window_bounds = array<i64: 1, 16, 128>}, {transform_indices = @transform_6, window_bounds = array<i64: 16, 128>}, {transform_indices = @transform_7, window_bounds = array<i64: 1, 8, 128>}]} {
    %c0 = arith.constant 0 : index
    %c0_0 = arith.constant 0 : index
    %0 = vector.load %arg6[%c0, %c0_0] : memref<16x128xf32, #tpu.memory_space<vmem>>, vector<16x128xf32>
    %c0_1 = arith.constant 0 : index
    %c0_2 = arith.constant 0 : index
    %c0_3 = arith.constant 0 : index
    %1 = vector.load %arg3[%c0_1, %c0_2, %c0_3] : memref<1x16x32xbf16, #tpu.memory_space<vmem>>, vector<1x16x32xbf16>
    %2 = vector.shape_cast %1 : vector<1x16x32xbf16> to vector<16x32xbf16>
    %c0_4 = arith.constant 0 : index
    %c0_5 = arith.constant 0 : index
    %c0_6 = arith.constant 0 : index
    %3 = vector.load %arg4[%c0_4, %c0_5, %c0_6] : memref<1x32x128xbf16, #tpu.memory_space<vmem>>, vector<1x32x128xbf16>
    %4 = vector.shape_cast %3 : vector<1x32x128xbf16> to vector<32x128xbf16>
    %cst = arith.constant dense<0.000000e+00> : vector<16x128xf32>
    %5 = tpu.matmul %2, %4, %cst {dimension_numbers = #tpu.dot_dimension_numbers<[1], [0], [0], [1], [0, 0, 1, 1], [], []>} : vector<16x32xbf16>, vector<32x128xbf16>, vector<16x128xf32> -> vector<16x128xf32>
    %c0_7 = arith.constant 0 : index
    %c0_8 = arith.constant 0 : index
    %c0_9 = arith.constant 0 : index
    %6 = vector.load %arg5[%c0_7, %c0_8, %c0_9] : memref<1x1x128xf32, #tpu.memory_space<vmem>>, vector<1x1x128xf32>
    %7 = vector.shape_cast %6 : vector<1x1x128xf32> to vector<1x128xf32>
    %8 = vector.broadcast %7 : vector<1x128xf32> to vector<16x128xf32>
    %9 = arith.addf %5, %8 : vector<16x128xf32>
    %10 = arith.negf %9 : vector<16x128xf32>
    %11 = math.exp %10 : vector<16x128xf32>
    %cst_10 = arith.constant 1.000000e+00 : f32
    %12 = vector.broadcast %cst_10 : f32 to vector<16x128xf32>
    %13 = arith.addf %12, %11 : vector<16x128xf32>
    %14 = arith.divf %12, %13 : vector<16x128xf32>
    %c0_11 = arith.constant 0 : index
    %c0_12 = arith.constant 0 : index
    %c0_13 = arith.constant 0 : index
    %15 = vector.load %arg7[%c0_11, %c0_12, %c0_13] : memref<1x16x128xf32, #tpu.memory_space<vmem>>, vector<1x16x128xf32>
    %16 = vector.shape_cast %15 : vector<1x16x128xf32> to vector<16x128xf32>
    %17 = vector.shape_cast %14 : vector<16x128xf32> to vector<1x16x128xf32>
    tpu.vector_store %arg7[%c0_11, %c0_12, %c0_13], %17 {strides = array<i32>} : memref<1x16x128xf32, #tpu.memory_space<vmem>>, vector<1x16x128xf32>,
    %18 = arith.subf %14, %0 : vector<16x128xf32>
    %19 = arith.mulf %18, %18 : vector<16x128xf32>
    %c0_i32 = arith.constant 0 : i32
    %20 = arith.cmpi eq, %arg1, %c0_i32 : i32
    %21 = arith.extui %20 : i1 to i32
    %c0_i32_14 = arith.constant 0 : i32
    %22 = arith.cmpi ne, %21, %c0_i32_14 : i32
    scf.if %22 {
      %cst_24 = arith.constant 0.000000e+00 : f32
      %36 = vector.broadcast %cst_24 : f32 to vector<16x128xf32>
      %c0_25 = arith.constant 0 : index
      %c0_26 = arith.constant 0 : index
      %37 = vector.load %arg8[%c0_25, %c0_26] : memref<16x128xf32, #tpu.memory_space<vmem>>, vector<16x128xf32>
      tpu.vector_store %arg8[%c0_25, %c0_26], %36 {strides = array<i32>} : memref<16x128xf32, #tpu.memory_space<vmem>>, vector<16x128xf32>,
      %cst_27 = arith.constant 0.000000e+00 : f32
      %38 = vector.broadcast %cst_27 : f32 to vector<16x128xf32>
      %c0_28 = arith.constant 0 : index
      %c0_29 = arith.constant 0 : index
      %39 = vector.load %arg10[%c0_28, %c0_29] : memref<16x128xf32, #tpu.memory_space<vmem>>, vector<16x128xf32>
      tpu.vector_store %arg10[%c0_28, %c0_29], %38 {strides = array<i32>} : memref<16x128xf32, #tpu.memory_space<vmem>>, vector<16x128xf32>,
    } else {
    }
    %c0_15 = arith.constant 0 : index
    %c0_16 = arith.constant 0 : index
    %23 = vector.load %arg8[%c0_15, %c0_16] : memref<16x128xf32, #tpu.memory_space<vmem>>, vector<16x128xf32>
    %24 = arith.index_cast %arg1 : i32 to index
    %25 = memref.load %arg2[%24] : memref<3xf32, #tpu.memory_space<smem>>
    %26 = vector.broadcast %25 : f32 to vector<16x128xf32>
    %27 = arith.mulf %26, %14 : vector<16x128xf32>
    %28 = arith.addf %23, %27 : vector<16x128xf32>
    %c0_17 = arith.constant 0 : index
    %c0_18 = arith.constant 0 : index
    %29 = vector.load %arg8[%c0_17, %c0_18] : memref<16x128xf32, #tpu.memory_space<vmem>>, vector<16x128xf32>
    tpu.vector_store %arg8[%c0_17, %c0_18], %28 {strides = array<i32>} : memref<16x128xf32, #tpu.memory_space<vmem>>, vector<16x128xf32>,
    %c0_19 = arith.constant 0 : index
    %c0_20 = arith.constant 0 : index
    %30 = vector.load %arg10[%c0_19, %c0_20] : memref<16x128xf32, #tpu.memory_space<vmem>>, vector<16x128xf32>
    %31 = arith.addf %30, %19 : vector<16x128xf32>
    %c0_21 = arith.constant 0 : index
    %c0_22 = arith.constant 0 : index
    %32 = vector.load %arg10[%c0_21, %c0_22] : memref<16x128xf32, #tpu.memory_space<vmem>>, vector<16x128xf32>
    tpu.vector_store %arg10[%c0_21, %c0_22], %31 {strides = array<i32>} : memref<16x128xf32, #tpu.memory_space<vmem>>, vector<16x128xf32>,
    %c2_i32 = arith.constant 2 : i32
    %33 = arith.cmpi eq, %arg1, %c2_i32 : i32
    %34 = arith.extui %33 : i1 to i32
    %c0_i32_23 = arith.constant 0 : i32
    %35 = arith.cmpi ne, %34, %c0_i32_23 : i32
    scf.if %35 {
      %36 = tpu.iota {dimensions = array<i32: 0>} : vector<16x128xi32>
      %c16_i32 = arith.constant 16 : i32
      %37 = arith.muli %arg0, %c16_i32 : i32
      %38 = vector.broadcast %37 : i32 to vector<16x128xi32>
      %39 = arith.addi %36, %38 : vector<16x128xi32>
      %40 = tpu.iota {dimensions = array<i32: 1>} : vector<16x128xi32>
      %c4_i32 = arith.constant 4 : i32
      %41 = vector.broadcast %c4_i32 : i32 to vector<16x128xi32>
      %42 = arith.cmpi slt, %39, %41 : vector<16x128xi32>
      %c16_i32_24 = arith.constant 16 : i32
      %43 = vector.broadcast %c16_i32_24 : i32 to vector<16x128xi32>
      %44 = arith.cmpi slt, %40, %43 : vector<16x128xi32>
      %45 = arith.andi %42, %44 : vector<16x128xi1>
      %46 = arith.extui %45 : vector<16x128xi1> to vector<16x128xi32>
      %47 = arith.sitofp %46 : vector<16x128xi32> to vector<16x128xf32>
      %c0_25 = arith.constant 0 : index
      %c0_26 = arith.constant 0 : index
      %48 = vector.load %arg8[%c0_25, %c0_26] : memref<16x128xf32, #tpu.memory_space<vmem>>, vector<16x128xf32>
      %49 = arith.subf %48, %0 : vector<16x128xf32>
      %c0_27 = arith.constant 0 : index
      %c0_28 = arith.constant 0 : index
      %50 = vector.load %arg10[%c0_27, %c0_28] : memref<16x128xf32, #tpu.memory_space<vmem>>, vector<16x128xf32>
      %cst_29 = arith.constant 1.000000e+00 : f32
      %51 = vector.broadcast %cst_29 : f32 to vector<16x128xf32>
      %52 = arith.mulf %51, %50 : vector<16x128xf32>
      %53 = arith.mulf %49, %49 : vector<16x128xf32>
      %cst_30 = arith.constant 1.000000e+00 : f32
      %54 = vector.broadcast %cst_30 : f32 to vector<16x128xf32>
      %55 = arith.mulf %54, %53 : vector<16x128xf32>
      %56 = arith.addf %52, %55 : vector<16x128xf32>
      %57 = arith.mulf %56, %47 : vector<16x128xf32>
      %58 = vector.shape_cast %57 : vector<16x128xf32> to vector<1x16x128xf32>
      %cst_31 = arith.constant dense<0.000000e+00> : vector<1xf32>
      %59 = vector.multi_reduction <add>, %58, %cst_31 [1, 2] : vector<1x16x128xf32> to vector<1xf32>
      %60 = vector.shape_cast %59 : vector<1xf32> to vector<1x1x1xf32>
      %61 = vector.extract %60[0, 0, 0] : f32 from vector<1x1x1xf32>
      %62 = vector.broadcast %61 : f32 to vector<8x128xf32>
      %c0_32 = arith.constant 0 : index
      %c0_33 = arith.constant 0 : index
      %c0_34 = arith.constant 0 : index
      %63 = vector.load %arg9[%c0_32, %c0_33, %c0_34] : memref<1x8x128xf32, #tpu.memory_space<vmem>>, vector<1x8x128xf32>
      %64 = vector.shape_cast %63 : vector<1x8x128xf32> to vector<8x128xf32>
      %65 = vector.shape_cast %62 : vector<8x128xf32> to vector<1x8x128xf32>
      tpu.vector_store %arg9[%c0_32, %c0_33, %c0_34], %65 {strides = array<i32>} : memref<1x8x128xf32, #tpu.memory_space<vmem>>, vector<1x8x128xf32>,
    } else {
    }
    return
  }
  func.func @transform_0(%arg0: i32, %arg1: i32) -> i32 {
    %c0_i32 = arith.constant 0 : i32
    %c0_i32_0 = arith.constant 0 : i32
    return %c0_i32 : i32
  }
  func.func @transform_1(%arg0: i32, %arg1: i32) -> (i32, i32, i32) {
    %c0_i32 = arith.constant 0 : i32
    %c0_i32_0 = arith.constant 0 : i32
    return %arg1, %arg0, %c0_i32 : i32, i32, i32
  }
  func.func @transform_2(%arg0: i32, %arg1: i32) -> (i32, i32, i32) {
    %c0_i32 = arith.constant 0 : i32
    %c0_i32_0 = arith.constant 0 : i32
    %c0_i32_1 = arith.constant 0 : i32
    return %arg1, %c0_i32, %c0_i32_0 : i32, i32, i32
  }
  func.func @transform_3(%arg0: i32, %arg1: i32) -> (i32, i32, i32) {
    %c0_i32 = arith.constant 0 : i32
    %c0_i32_0 = arith.constant 0 : i32
    %c0_i32_1 = arith.constant 0 : i32
    return %arg1, %c0_i32, %c0_i32_0 : i32, i32, i32
  }
  func.func @transform_4(%arg0: i32, %arg1: i32) -> (i32, i32) {
    %c0_i32 = arith.constant 0 : i32
    %c0_i32_0 = arith.constant 0 : i32
    return %arg0, %c0_i32 : i32, i32
  }
  func.func @transform_5(%arg0: i32, %arg1: i32) -> (i32, i32, i32) {
    %c0_i32 = arith.constant 0 : i32
    %c0_i32_0 = arith.constant 0 : i32
    return %arg1, %arg0, %c0_i32 : i32, i32, i32
  }
  func.func @transform_6(%arg0: i32, %arg1: i32) -> (i32, i32) {
    %c0_i32 = arith.constant 0 : i32
    %c0_i32_0 = arith.constant 0 : i32
    return %arg0, %c0_i32 : i32, i32
  }
  func.func @transform_7(%arg0: i32, %arg1: i32) -> (i32, i32, i32) {
    %c0_i32 = arith.constant 0 : i32
    %c0_i32_0 = arith.constant 0 : i32
    %c0_i32_1 = arith.constant 0 : i32
    return %arg0, %c0_i32, %c0_i32_0 : i32, i32, i32
  }
}

</mosaic_0001>

<bundles_post_ra>
// kernel: pipeline_forward.1
= control target key start
LH: loop header
LB: loop body
LE: loop exit
PB: predicated region body
PF: predicated region fallthrough
CT: control target
= control target key end

     0   :  { %13 = vsyncpa [#allocation4], 0  ;;  %s955_s24 = smov 0   ;;  %s957_s25 = smov 0   ;;  %s1065_s0 = inlined_call_operand.vmem [shape: f32[3], index: 0, kind: input, shape index: {}]   ;;  %s1066_s1 = inlined_call_operand.vmem [shape: bf16[3,16,32], index: 1, kind: input, shape index: {}]   ;;  %s1067_s2 = inlined_call_operand.vmem [shape: bf16[3,32,128], index: 2, kind: input, shape index: {}]   ;;  %s1068_s3 = inlined_call_operand.vmem [shape: f32[3,1,128], index: 3, kind: input, shape index: {}]   ;;  %s1069_s4 = inlined_call_operand.vmem [shape: f32[16,128], index: 4, kind: input, shape index: {}]   ;;  %s1070_s5 = inlined_call_operand.vmem [shape: f32[3,16,128], index: 5, kind: output, shape index: {0}]   ;;  %s1071_s6 = inlined_call_operand.vmem [shape: f32[16,128], index: 6, kind: output, shape index: {1}]   ;;  %s1072_s7 = inlined_call_operand.vmem [shape: f32[1,8,128], index: 7, kind: output, shape index: {2}]  }
   0x1   :  { %s959_s26 = smov 0  }
   0x2 LB: > { %s772_s27 = sadd.s32 4294967295, %s908_s26   ;;  %s28_s28 = sadd.s32 1, %s904_s25  ;;  %s908_s26 = sphi %s959_s26, %s19_s26   ;;  %s904_s25 = sphi %s957_s25, %s1076_s25   ;;  %s900_s24 = sphi %s955_s24, %s1075_s24  }
   0x3   : > { %p29_p0 = scmp.ge.s32.totalorder %s28_s28, 3  ;;  %p774_p1 = scmp.ge.s32.totalorder %s908_s26, 1 }
   0x4   : > { %p243_p2 = scmp.lt.s32.totalorder %s908_s26, 4  ;;  %p980_p4 = scmp.eq.s32.totalorder %s772_s27, 0 }
   0x5   : > { %s1078_s28 = smov (%p29_p0, %s28_s28), 0  ;;  %s256_s10 = sshll.u32 %s1065_s0, 4  ;;  %s257_s10 = int_to_ptr.vmem [resolvable:$true] %s256_s10 }
   0x6   : > { %p976_p3 = pnand %p774_p1, %p243_p2  ;;  %s867_s11 = scalar_lea.vmem %s257_s10, 16 }
   0x7   : > { %p868_p7 = scmp.ne.s32.totalorder %s257_s10, %s867_s11  ;;  %p875_p11 = scmp.lt.s32.totalorder %s257_s10, %s257_s10 }
   0x8   : > { %p821_p5 = pneg %p976_p3  ;;  %p876_p12 = scmp.lt.s32.totalorder %s867_s11, %s867_s11 }
   0xa   : > { %p822_p6 = pnand %p980_p4, %p821_p5  ;;  %p877_p13 = por %p876_p12, %p875_p11 }
   0xc   : > { %p869_p8 = pneg %p822_p6 }
   0xe   : > { %p870_p9 = pnand %p869_p8, %p868_p7 }
  0x10   : > { %p871_p10 = pneg %p870_p9 }
  0x12   : > { %p878_p0 = pnand %p877_p13, %p871_p10 }
  0x14   : > { %881 = shalt.err (!%p878_p0)
}
  0x15   : > { %s910_s12 = smov [#allocation3]   ;;  %305 = sbr.rel (%p976_p3) target bundleno = 525 (0x20d), region = 40 }
  0x16   : > { %824 = dma.vmem_to_smem (!%p822_p6), %s257_s10, 16, %s910_s12, [#allocation4]  }
  0x1c   : > { %895 = dma.done.wait (%p980_p4), [#allocation4], 16  }
  0x1d   : > { %897 = vsyncadd (%p980_p4), [#allocation4], 4294967280 }
  0x1e   : > { %311 = sfence }
  0x1f   : > { %p369_p1 = scmp.lt.s32.totalorder %s900_s24, 2  ;;  %v911_v0 = vmov 0.0   ;;  %vm912_vm0 = vmmov 0   ;;  %vm445_vm1 = vcmask 261120   ;;  %v413_v17 = vld [vmem:[%s1069_s4] sm:$0xff]  ;;  %v414_v19 = vld [vmem:[%s1069_s4 + $0x8] sm:$0xff] }
  0x20   : > { %807 = vmatprep.subr.bf16.mxu0 %v911_v0  ;;  %811 = vmatprep.mubr.msk.bf16.mxu0 %vm912_vm0, %v911_v0  ;;  %p793_p2 = scmp.ne.s32.totalorder %s900_s24, 0 }
  0x21   : > { %s999_s13 = scalar_select %p369_p1, %s900_s24, 2 }
  0x22   : > { %v913_v25 = vmov (!%p793_p2), 0.0  }
  0x23   : > { %s802_s14 = sshll.u32 %s999_s13, 4  ;;  %s801_s15 = sshll.u32 %s999_s13, 3  ;;  %512 = vst [vmem:[%s1071_s6] sm:$0xff] (!%p793_p2), %v913_v25  ;;  %513 = vst [vmem:[%s1071_s6 + $0x8] sm:$0xff] (!%p793_p2), %v913_v25 }
  0x24   : > { %s382_s18 = scalar_lea.vmem %s1067_s2, %s802_s14  ;;  %s376_s21 = scalar_lea.vmem %s1066_s1, %s801_s15  ;;  %514 = vst [vmem:[#allocation2] sm:$0xff] (!%p793_p2), %v913_v25  ;;  %515 = vst [vmem:[#allocation2 + $0x8] sm:$0xff] (!%p793_p2), %v913_v25 }
  0x25   : > { %v856_v1 = vld [vmem:[%s382_s18] sm:$0xff]   ;;  %v857_v2 = vld [vmem:[%s382_s18 + $0x8] sm:$0xff]   ;;  %s385_s27 = scalar_lea.vmem %s1068_s3, %s999_s13  ;;  %s400_s8 = scalar_lea.vmem %s1070_s5, %s802_s14 }
  0x26   : > { %808 = vmatpush3.bf16.msra.mxu0 %v856_v1  ;;  %v858_v3 = vld [vmem:[%s376_s21] sm:$0xff]  }
  0x27   : > { %809 = vmatprep.subr.bf16.mxu0 %v911_v0  ;;  %v786_v4 = vld [vmem:[%s385_s27] ss:$0 sm:$0xff] }
  0x2a   : > { %810 = vmatpush3.bf16.msra.mxu0 %v857_v2 }
  0x2d   : > { %812 = vmatmul.mubr.msk.bf16.vlgmr.msra.gmra.mrb[0].mxu0 %vm445_vm1, %v858_v3 }
 0x100   : > { %v483_v5 = vpop.f32.mrb[0].mxu0 }
 0x101   : > { %v484_v6 = vadd.f32 %v786_v4, %v483_v5  ;;  %v813_v7 = vpop.f32.mrb[1].mxu0 }
 0x102   : > { %v486_v8 = vpop.f32.mrb[2].mxu0 }
 0x103   : > { %v791_v9 = vmul.f32 -1.442695, %v484_v6  ;;  %v487_v10 = vadd.f32 %v786_v4, %v486_v8  ;;  %v814_v11 = vpop.f32.mrb[3].mxu0 }
 0x105   : > { %859 = vpow2.f32 %v791_v9  ;;  %v792_v12 = vmul.f32 -1.442695, %v487_v10 }
 0x107   : > { %861 = vpow2.f32 %v792_v12 }
 0x10f   : > { %v860_v13 = vpop.eup %859 }
 0x110   : > { %v496_v14 = vadd.f32 1.0, %v860_v13 }
 0x111   : > { %v862_v15 = vpop.eup %861 }
 0x112   : > { %863 = vrcp.f32 %v496_v14  ;;  %v497_v16 = vadd.f32 1.0, %v862_v15 }
 0x114   : > { %865 = vrcp.f32 %v497_v16 }
 0x11b   : > { %511 = sbr.rel (%p793_p2) target bundleno = 290 (0x122), region = 48 }
 0x11c   : > { %v864_v18 = vpop.eup %863 }
 0x11d   : > { %502 = vst [vmem:[%s400_s8] sm:$0xff] %v864_v18  ;;  %v504_v20 = vsub.f32 %v864_v18, %v413_v17 }
 0x11e   : > { %v866_v21 = vpop.eup %865 }
 0x11f   : > { %v506_v22 = vmul.f32 %v504_v20, %v504_v20  ;;  %503 = vst [vmem:[%s400_s8 + $0x8] sm:$0xff] %v866_v21  ;;  %v505_v23 = vsub.f32 %v866_v21, %v414_v19 }
 0x121   : > { %v507_v24 = vmul.f32 %v505_v23, %v505_v23 }
 0x122 PF: > { %s518_s17 = sld [smem:[#allocation3 + %s900_s24]]  ;;  %v526_v26 = vld [vmem:[#allocation2] sm:$0xff]  ;;  %v527_v28 = vld [vmem:[#allocation2 + $0x8] sm:$0xff]  ;;  %p794_p3 = scmp.ne.s32.totalorder %s900_s24, 2 }
 0x123   : > { %v528_v27 = vadd.f32 %v526_v26, %v506_v22  ;;  %v529_v29 = vadd.f32 %v527_v28, %v507_v24  ;;  %v516_v30 = vld [vmem:[%s1071_s6] sm:$0xff]  ;;  %v517_v32 = vld [vmem:[%s1071_s6 + $0x8] sm:$0xff]  ;;  %v536_v37 = vlaneseq (!%p794_p3)  ;;  %v914_v50 = vmov (!%p794_p3), 0.0  }
 0x125   : > { %530 = vst [vmem:[#allocation2] sm:$0xff] %v528_v27  ;;  %531 = vst [vmem:[#allocation2 + $0x8] sm:$0xff] %v529_v29  ;;  %v537_v42 = vshrl.u32 (!%p794_p3), %v536_v37, 7  ;;  %v544_v43 = vand.u32 (!%p794_p3), 127, %v536_v37 }
 0x127   : > { %535 = sbr.rel (%p794_p3) target bundleno = 525 (0x20d), region = 52  ;;  %vm545_vm2 = vcmp.lt.s32.totalorder (!%p794_p3), %v537_v42, 4  ;;  %vm547_vm3 = vcmp.lt.s32.totalorder (!%p794_p3), %v544_v43, 16 }
 0x128   : > { %v519_v31 = vstv %s518_s17  ;;  %vm548_vm4 = vmand (!%p794_p3), %vm545_vm2, %vm547_vm3 }
 0x129   : > { %v520_v33 = vmul.f32 %v864_v18, %v519_v31  ;;  %v521_v34 = vmul.f32 %v866_v21, %v519_v31  ;;  %v795_v51 = vsel (!%p794_p3), %vm548_vm4, 1.0, %v914_v50 }
 0x12b   : > { %v522_v35 = vadd.f32 %v520_v33, %v516_v30  ;;  %v523_v36 = vadd.f32 %v521_v34, %v517_v32 }
 0x12c   : > { %v558_v44 = vld [vmem:[#allocation2] sm:$0xff] (!%p794_p3)  ;;  %v559_v45 = vld [vmem:[#allocation2 + $0x8] sm:$0xff] (!%p794_p3) }
 0x12d   : > { %524 = vst [vmem:[%s1071_s6] sm:$0xff] %v522_v35  ;;  %525 = vst [vmem:[%s1071_s6 + $0x8] sm:$0xff] %v523_v36 }
 0x134   : > { %v554_v38 = vld [vmem:[%s1071_s6] sm:$0xff]  ;;  %v555_v39 = vld [vmem:[%s1071_s6 + $0x8] sm:$0xff] }
 0x135   : > { %v556_v40 = vsub.f32 %v554_v38, %v413_v17  ;;  %v557_v41 = vsub.f32 %v555_v39, %v414_v19 }
 0x137   : > { %v560_v46 = vmul.f32 %v556_v40, %v556_v40  ;;  %v561_v47 = vmul.f32 %v557_v41, %v557_v41 }
 0x139   : > { %v562_v48 = vadd.f32 %v560_v46, %v558_v44  ;;  %v563_v49 = vadd.f32 %v561_v47, %v559_v45 }
 0x13b   : > { %v564_v52 = vmul.f32 %v795_v51, %v562_v48  ;;  %v565_v53 = vmul.f32 0.0, %v563_v49 }
 0x13d   : > { %v566_v54 = vadd.f32 %v565_v53, %v564_v52 }
 0x13f   : > { %567 = vadd.xlane.f32.xlu0 %v566_v54 }
 0x1cc   : > { %v568_v55 = vpop.xlane.xlu0 %567 }
 0x1cd   : > { %v569_v56 = vrot.slane %v568_v55, 4 }
 0x1cf   : > { %v570_v57 = vadd.f32 %v569_v56, %v568_v55 }
 0x1d1   : > { %v571_v58 = vrot.slane %v570_v57, 2 }
 0x1d3   : > { %v572_v59 = vadd.f32 %v571_v58, %v570_v57 }
 0x1d5   : > { %v573_v60 = vrot.slane %v572_v59, 1 }
 0x1d7   : > { %v574_v61 = vadd.f32 %v573_v60, %v572_v59 }
 0x1d9   : > { %815 = vpush %v574_v61 }
 0x20a   : > { %s816_s24 = spop %815 }
 0x20b   : > { %v576_v62 = vstv %s816_s24 }
 0x20c   : > { %577 = vst [vmem:[%s1072_s7] sm:$0xff] %v576_v62 }
 0x20d PF: > { %s19_s26 = sadd.s32 1, %s908_s26   ;;  %s1075_s24 = smov %s904_s25 }
 0x20e   : > { %p16_p4 = scmp.ge.s32.totalorder %s19_s26, 5   ;;  %s1076_s25 = smov %s1078_s28 }
 0x210   :  { %18 = sbr.rel (!%p16_p4) target bundleno = 2 (0x2), region = 116 }
 0x217   :  { %639 = vsyncpa [#allocation4], 1 }
 0x218   :  { %641 = vsyncpa [#allocation4 + $0x1], 1 }

</bundles_post_ra>
